<compile_context>
chip_gen: v7x
topology: tpu7x:2x2x1
jax: 0.10.0
libtpu: 0.0.40
codegen_flags: <defaults>
</compile_context>

<pallas_src>
import jax
import jax.numpy as jnp
from jax.experimental import pallas as pl
from jax.experimental.pallas import tpu as pltpu


# ----------------------------- Pallas kernel --------------------------------
def simple_cnn_kernel(x_ref, w1_ref, b1_ref, w2_ref, b2_ref, out_ref):
    """One batch tile of the fused SimpleCNN forward.

    Shapes seen by the kernel:
      x_ref  : (TB, Dp)        Dp = round_up(T*C_in, 128), matmul dtype (bf16/f32)
      w1_ref : (Dp, Hp)        fused conv+fc1 weight (Hp = padded hidden), matmul dtype
      b1_ref : (1, Hp)         fused bias, float32
      w2_ref : (Hp, NCp)       fc2 weight, padded classes, matmul dtype
      b2_ref : (1, NCp)        fc2 bias, padded classes = -1e30, float32
      out_ref: (TB, NCp)       log-probabilities (padded lanes are junk; sliced off)
    """
    # conv1d -> sum over time -> fc1   == one matmul with the fused weight.
    h = jnp.dot(x_ref[...], w1_ref[...], preferred_element_type=jnp.float32)
    h = jnp.maximum(h + b1_ref[...], 0.0)                      # ReLU, f32 VPU math

    # Dropout(p=0.2) is identity in eval/inference mode.

    # fc2 + log_softmax over the (lane-dense, 128-padded) class axis.
    logits = jnp.dot(h.astype(w2_ref.dtype), w2_ref[...],
                     preferred_element_type=jnp.float32)
    logits = logits + b2_ref[...]                              # padded lanes -> -1e30
    m = jnp.max(logits, axis=-1, keepdims=True)
    z = logits - m
    lse = jnp.log(jnp.sum(jnp.exp(z), axis=-1, keepdims=True))
    out_ref[...] = (z - lse).astype(out_ref.dtype)


# ------------------------------ helpers --------------------------------------
def _round_up(a, m):
    return ((a + m - 1) // m) * m


def build_fused_params(torch_params, *, seq_len, window_size, window_stride,
                       matmul_dtype=jnp.bfloat16, lane=128):
    """Fold conv1d+time-sum+fc1 into one weight/bias; pad D/hidden/classes to 128.

    torch_params: (w_conv (C_out, C_in, K), b_conv (C_out,),
                   w_fc1 (H, C_out),        b_fc1 (H,),
                   w_fc2 (NC, H),           b_fc2 (NC,))
    Returns ((W_fused (Dp, Hp), b_fused (1, Hp), W2 (Hp, NCp), b2 (1, NCp)), num_classes).
    Weights are pre-cast to matmul_dtype once here; biases stay float32.
    Assumes Conv1d(padding=0, dilation=1, groups=1), as in the module.
    """
    w_conv, b_conv, w_fc1, b_fc1, w_fc2, b_fc2 = torch_params
    c_out, c_in, K = w_conv.shape
    T = seq_len
    assert T >= K, "seq_len must be >= window_size (padding=0 conv)"
    l_out = (T - K) // window_stride + 1

    # Effective conv weight: W_eff[t, i, c] = sum_{(t_win,k): t_win*s+k==t} w_conv[c,i,k]
    w_eff = jnp.zeros((T, c_in, c_out), jnp.float32)
    for t_win in range(l_out):
        for k in range(K):
            w_eff = w_eff.at[t_win * window_stride + k].add(
                jnp.transpose(w_conv[:, :, k]).astype(jnp.float32))
    w_eff = w_eff.reshape(T * c_in, c_out)

    # Fold fc1:  conv_sum @ W1^T + b1  ==  x_flat @ (W_eff @ W1^T) + (l_out*b_conv @ W1^T + b1)
    w_fused = w_eff @ w_fc1.T.astype(jnp.float32)                      # (D, H)
    b_fused = (jnp.float32(l_out) * b_conv) @ w_fc1.T + b_fc1           # (H,)

    D = w_fused.shape[0]
    H = w_fused.shape[1]
    NC = w_fc2.shape[0]
    Dp = _round_up(D, lane)      # lane-dense contraction dim (exact: zero rows)
    Hp = _round_up(H, lane)
    NCp = _round_up(NC, lane)

    # Pad D rows and hidden columns with exact zeros (ReLU(0)=0, zero fc2 rows -> no effect).
    w_fused_p = jnp.zeros((Dp, Hp), jnp.float32).at[:D, :H].set(w_fused)
    b_fused_p = jnp.zeros((1, Hp), jnp.float32).at[:, :H].set(b_fused)

    # Pad class dim: zero weight columns, -1e30 bias so log_softmax ignores them
    # (logits math stays f32 inside the kernel, so -1e30 is safe).
    w2_p = jnp.zeros((Hp, NCp), jnp.float32).at[:H, :NC].set(w_fc2.T.astype(jnp.float32))
    b2_p = jnp.full((1, NCp), -1e30, jnp.float32).at[:, :NC].set(b_fc2)

    # Pre-cast matmul operands ONCE here (avoids a per-forward XLA cast pass).
    w_fused_p = w_fused_p.astype(matmul_dtype)
    w2_p = w2_p.astype(matmul_dtype)

    return (w_fused_p, b_fused_p, w2_p, b2_p), NC


def _pallas_forward(x_flat, w1, b1, w2, b2, *, TB, n_blocks, B_pad, Dp, Hp, NCp,
                    out_dtype, single_buffer_weights):
    # Grid-invariant weights/biases: single-buffered (no point double-buffering
    # blocks whose index_map never changes).
    w_kw = dict(pipeline_mode=pl.Buffered(1)) if single_buffer_weights else {}

    itemsize = jnp.dtype(w1.dtype).itemsize
    cost = pl.CostEstimate(
        flops=2 * B_pad * (Dp * Hp + Hp * NCp),
        transcendentals=B_pad * NCp,                       # exp in log_softmax
        bytes_accessed=(B_pad * Dp * itemsize              # x stream
                        + Dp * Hp * itemsize + Hp * NCp * itemsize
                        + (Hp + NCp) * 4                   # biases (f32)
                        + B_pad * NCp * jnp.dtype(out_dtype).itemsize),
    )

    grid_spec = pltpu.PrefetchScalarGridSpec(
        num_scalar_prefetch=0,
        grid=(n_blocks,),
        in_specs=[
            pl.BlockSpec((TB, Dp), lambda i: (i, 0)),              # x tile (streamed)
            pl.BlockSpec((Dp, Hp), lambda i: (0, 0), **w_kw),      # fused conv+fc1 weight
            pl.BlockSpec((1, Hp), lambda i: (0, 0), **w_kw),       # fused bias (f32)
            pl.BlockSpec((Hp, NCp), lambda i: (0, 0), **w_kw),     # fc2 weight (padded)
            pl.BlockSpec((1, NCp), lambda i: (0, 0), **w_kw),      # fc2 bias (padded, f32)
        ],
        out_specs=pl.BlockSpec((TB, NCp), lambda i: (i, 0)),
    )

    return pl.pallas_call(
        simple_cnn_kernel,
        out_shape=jax.ShapeDtypeStruct((B_pad, NCp), out_dtype),
        grid_spec=grid_spec,
        compiler_params=pltpu.CompilerParams(
            dimension_semantics=("parallel",)),            # shard batch blocks on v7x's 2 TCs
        cost_estimate=cost,
    )(x_flat, w1, b1, w2, b2)


def simple_cnn_forward(x, fused_params, num_classes, *, out_dtype=jnp.float32,
                       tb_cap=512):
    """x: (B, T, C_in) float32. Returns (B, num_classes) log-probs (out_dtype)."""
    B, T, C_in = x.shape
    w1, b1, w2, b2 = fused_params
    D = T * C_in
    Dp = w1.shape[0]
    Hp = w1.shape[1]
    NCp = w2.shape[1]
    assert Dp >= D and Dp % 128 == 0

    matmul_dtype = w1.dtype
    # Flatten (T, C_in) -> contraction axis, cast to matmul dtype, pad lanes D -> Dp.
    x_flat = x.reshape(B, D).astype(matmul_dtype)
    if Dp != D:
        x_flat = jnp.pad(x_flat, ((0, 0), (0, Dp - D)))

    # Batch tiling.  Static 512-row tile for large batches (VMEM per step:
    # 2*TB*(Dp*itemsize + NCp*4) + weights  ~= a few hundred KiB here, far under
    # the v7x 32 MiB scoped default, let alone v5e/v6e 128 MiB).  For small
    # batches split into >=2 blocks so the "parallel" axis feeds both v7x TCs.
    if B >= 2 * tb_cap:
        TB = tb_cap
    else:
        TB = max(8, _round_up((B + 1) // 2, 8))
    n_blocks = max(2, -(-B // TB))
    B_pad = n_blocks * TB
    if B_pad != B:
        x_flat = jnp.pad(x_flat, ((0, B_pad - B), (0, 0)))

    kwargs = dict(TB=TB, n_blocks=n_blocks, B_pad=B_pad, Dp=Dp, Hp=Hp, NCp=NCp,
                  out_dtype=out_dtype)
    try:
        out_pad = _pallas_forward(x_flat, w1, b1, w2, b2,
                                  single_buffer_weights=True, **kwargs)
    except Exception:
        # Fallback if this JAX build rejects pl.Buffered(1) on a pallas_call spec.
        out_pad = _pallas_forward(x_flat, w1, b1, w2, b2,
                                  single_buffer_weights=False, **kwargs)

    return out_pad[:B, :num_classes]


# ------------------------- params & pure-JAX reference ----------------------
def init_torch_params(key, input_size, conv_hidden, window_size,
                      linear_hidden, num_classes):
    k = jax.random.split(key, 6)
    w_conv = jax.random.normal(k[0], (conv_hidden, input_size, window_size), jnp.float32) * 0.1
    b_conv = jax.random.normal(k[1], (conv_hidden,), jnp.float32) * 0.1
    w_fc1 = jax.random.normal(k[2], (linear_hidden, conv_hidden), jnp.float32) * 0.1
    b_fc1 = jax.random.normal(k[3], (linear_hidden,), jnp.float32) * 0.1
    w_fc2 = jax.random.normal(k[4], (num_classes, linear_hidden), jnp.float32) * 0.1
    b_fc2 = jax.random.normal(k[5], (num_classes,), jnp.float32) * 0.1
    return (w_conv, b_conv, w_fc1, b_fc1, w_fc2, b_fc2)


def reference_forward(x, torch_params, *, window_size, window_stride):
    """Pure-JAX reference mirroring the PyTorch forward (eval mode)."""
    w_conv, b_conv, w_fc1, b_fc1, w_fc2, b_fc2 = torch_params
    B, T, C_in = x.shape
    K = window_size
    l_out = (T - K) // window_stride + 1
    x_t = jnp.transpose(x, (0, 2, 1))                                  # (B, C_in, T)
    conv_out = jnp.stack(
        [jnp.einsum('bik,oik->bo',
                    x_t[:, :, t * window_stride:t * window_stride + K], w_conv)
         + b_conv for t in range(l_out)], axis=-1)                     # (B, C_out, L)
    conv_sum = jnp.sum(conv_out, axis=-1)                              # (B, C_out)
    h = jnp.maximum(conv_sum @ w_fc1.T + b_fc1, 0.0)
    logits = h @ w_fc2.T + b_fc2
    return jax.nn.log_softmax(logits, axis=1)


if __name__ == "__main__":
    # Small shapes consistent with the module.
    B, T = 2, 16
    input_size = 4
    conv1d_hidden_size = 8
    window_size = 3
    window_stride = 2
    linear_hidden_size = 32
    num_classes = 5

    key = jax.random.PRNGKey(0)
    kx, kp = jax.random.split(key)
    x = jax.random.normal(kx, (B, T, input_size), jnp.float32)

    torch_params = init_torch_params(kp, input_size, conv1d_hidden_size,
                                     window_size, linear_hidden_size, num_classes)

    ref = reference_forward(x, torch_params,
                            window_size=window_size, window_stride=window_stride)

    # float32 matmul path: strict check.
    fused_f32, nc = build_fused_params(torch_params, seq_len=T,
                                       window_size=window_size,
                                       window_stride=window_stride,
                                       matmul_dtype=jnp.float32)
    out_f32 = simple_cnn_forward(x, fused_f32, nc)
    out_f32 = jax.block_until_ready(out_f32)
    assert out_f32.shape == (B, num_classes)
    assert jnp.allclose(out_f32, ref, atol=1e-4, rtol=1e-4), "f32 mismatch vs reference"

    # bf16 matmul path (default; v5e/v6e/v7x MXU rate): looser tolerance, f32 accumulation.
    fused_bf16, _ = build_fused_params(torch_params, seq_len=T,
                                       window_size=window_size,
                                       window_stride=window_stride)   # bf16 default
    out_bf16 = simple_cnn_forward(x, fused_bf16, nc)
    out_bf16 = jax.block_until_ready(out_bf16)
    assert jnp.allclose(out_bf16, ref, atol=5e-2, rtol=5e-2), "bf16 mismatch vs reference"

    # bf16 output path (halves the HBM write stream when consumers accept bf16 log-probs).
    out_bf16_out = simple_cnn_forward(x, fused_bf16, nc, out_dtype=jnp.bfloat16)
    out_bf16_out = jax.block_until_ready(out_bf16_out)
    assert jnp.allclose(out_bf16_out.astype(jnp.float32), ref, atol=1e-1, rtol=1e-1), \
        "bf16-output mismatch vs reference"

    print("KERNEL_OK")
</pallas_src>

<mosaic_0001>
module attributes {stable_mosaic.version = 11 : i64} {
  func.func @simple_cnn_kernel(%arg0: i32, %arg1: memref<8x128xf32, #tpu.memory_space<vmem>>, %arg2: memref<128x128xf32, #tpu.memory_space<vmem>>, %arg3: memref<1x128xf32, #tpu.memory_space<vmem>>, %arg4: memref<128x128xf32, #tpu.memory_space<vmem>>, %arg5: memref<1x128xf32, #tpu.memory_space<vmem>>, %arg6: memref<8x128xf32, #tpu.memory_space<vmem>>) attributes {dimension_semantics = [#tpu.dimension_semantics<parallel>], iteration_bounds = array<i64: 2>, scalar_prefetch = 0 : i64, scratch_operands = 0 : i64, tpu.core_type = #tpu.core_type<tc>, window_params = [{transform_indices = @transform_0, window_bounds = array<i64: 8, 128>}, {pipeline_mode = #tpu.pipeline_mode<synchronous>, transform_indices = @transform_1, window_bounds = array<i64: 128, 128>}, {pipeline_mode = #tpu.pipeline_mode<synchronous>, transform_indices = @transform_2, window_bounds = array<i64: 1, 128>}, {pipeline_mode = #tpu.pipeline_mode<synchronous>, transform_indices = @transform_3, window_bounds = array<i64: 128, 128>}, {pipeline_mode = #tpu.pipeline_mode<synchronous>, transform_indices = @transform_4, window_bounds = array<i64: 1, 128>}, {transform_indices = @transform_5, window_bounds = array<i64: 8, 128>}]} {
    %c0 = arith.constant 0 : index
    %c0_0 = arith.constant 0 : index
    %0 = vector.load %arg1[%c0, %c0_0] : memref<8x128xf32, #tpu.memory_space<vmem>>, vector<8x128xf32>
    %c0_1 = arith.constant 0 : index
    %c0_2 = arith.constant 0 : index
    %1 = vector.load %arg2[%c0_1, %c0_2] : memref<128x128xf32, #tpu.memory_space<vmem>>, vector<128x128xf32>
    %cst = arith.constant dense<0.000000e+00> : vector<8x128xf32>
    %2 = tpu.matmul %0, %1, %cst {dimension_numbers = #tpu.dot_dimension_numbers<[1], [0], [0], [1], [0, 0, 1, 1], [], []>} : vector<8x128xf32>, vector<128x128xf32>, vector<8x128xf32> -> vector<8x128xf32>
    %c0_3 = arith.constant 0 : index
    %c0_4 = arith.constant 0 : index
    %3 = vector.load %arg3[%c0_3, %c0_4] : memref<1x128xf32, #tpu.memory_space<vmem>>, vector<1x128xf32>
    %4 = vector.broadcast %3 : vector<1x128xf32> to vector<8x128xf32>
    %5 = arith.addf %2, %4 : vector<8x128xf32>
    %cst_5 = arith.constant 0.000000e+00 : f32
    %6 = vector.broadcast %cst_5 : f32 to vector<8x128xf32>
    %7 = arith.maximumf %5, %6 : vector<8x128xf32>
    %c0_6 = arith.constant 0 : index
    %c0_7 = arith.constant 0 : index
    %8 = vector.load %arg4[%c0_6, %c0_7] : memref<128x128xf32, #tpu.memory_space<vmem>>, vector<128x128xf32>
    %cst_8 = arith.constant dense<0.000000e+00> : vector<8x128xf32>
    %9 = tpu.matmul %7, %8, %cst_8 {dimension_numbers = #tpu.dot_dimension_numbers<[1], [0], [0], [1], [0, 0, 1, 1], [], []>} : vector<8x128xf32>, vector<128x128xf32>, vector<8x128xf32> -> vector<8x128xf32>
    %c0_9 = arith.constant 0 : index
    %c0_10 = arith.constant 0 : index
    %10 = vector.load %arg5[%c0_9, %c0_10] : memref<1x128xf32, #tpu.memory_space<vmem>>, vector<1x128xf32>
    %11 = vector.broadcast %10 : vector<1x128xf32> to vector<8x128xf32>
    %12 = arith.addf %9, %11 : vector<8x128xf32>
    %cst_11 = arith.constant dense<0xFF800000> : vector<8xf32>
    %13 = vector.multi_reduction <maximumf>, %12, %cst_11 [1] : vector<8x128xf32> to vector<8xf32>
    %14 = vector.shape_cast %13 : vector<8xf32> to vector<8x1xf32>
    %15 = vector.broadcast %14 : vector<8x1xf32> to vector<8x128xf32>
    %16 = arith.subf %12, %15 : vector<8x128xf32>
    %17 = math.exp %16 : vector<8x128xf32>
    %cst_12 = arith.constant dense<0.000000e+00> : vector<8xf32>
    %18 = vector.multi_reduction <add>, %17, %cst_12 [1] : vector<8x128xf32> to vector<8xf32>
    %19 = vector.shape_cast %18 : vector<8xf32> to vector<8x1xf32>
    %20 = math.log %19 : vector<8x1xf32>
    %21 = vector.broadcast %20 : vector<8x1xf32> to vector<8x128xf32>
    %22 = arith.subf %16, %21 : vector<8x128xf32>
    %c0_13 = arith.constant 0 : index
    %c0_14 = arith.constant 0 : index
    %23 = vector.load %arg6[%c0_13, %c0_14] : memref<8x128xf32, #tpu.memory_space<vmem>>, vector<8x128xf32>
    tpu.vector_store %arg6[%c0_13, %c0_14], %22 {strides = array<i32>} : memref<8x128xf32, #tpu.memory_space<vmem>>, vector<8x128xf32>,
    return
  }
  func.func @transform_0(%arg0: i32) -> (i32, i32) {
    %c0_i32 = arith.constant 0 : i32
    %c0_i32_0 = arith.constant 0 : i32
    return %arg0, %c0_i32 : i32, i32
  }
  func.func @transform_1(%arg0: i32) -> (i32, i32) {
    %c0_i32 = arith.constant 0 : i32
    %c0_i32_0 = arith.constant 0 : i32
    %c0_i32_1 = arith.constant 0 : i32
    return %c0_i32, %c0_i32_0 : i32, i32
  }
  func.func @transform_2(%arg0: i32) -> (i32, i32) {
    %c0_i32 = arith.constant 0 : i32
    %c0_i32_0 = arith.constant 0 : i32
    %c0_i32_1 = arith.constant 0 : i32
    return %c0_i32, %c0_i32_0 : i32, i32
  }
  func.func @transform_3(%arg0: i32) -> (i32, i32) {
    %c0_i32 = arith.constant 0 : i32
    %c0_i32_0 = arith.constant 0 : i32
    %c0_i32_1 = arith.constant 0 : i32
    return %c0_i32, %c0_i32_0 : i32, i32
  }
  func.func @transform_4(%arg0: i32) -> (i32, i32) {
    %c0_i32 = arith.constant 0 : i32
    %c0_i32_0 = arith.constant 0 : i32
    %c0_i32_1 = arith.constant 0 : i32
    return %c0_i32, %c0_i32_0 : i32, i32
  }
  func.func @transform_5(%arg0: i32) -> (i32, i32) {
    %c0_i32 = arith.constant 0 : i32
    %c0_i32_0 = arith.constant 0 : i32
    return %arg0, %c0_i32 : i32, i32
  }
}

module attributes {stable_mosaic.version = 11 : i64} {
  func.func @simple_cnn_kernel(%arg0: i32, %arg1: memref<8x128xf32, #tpu.memory_space<vmem>>, %arg2: memref<128x128xf32, #tpu.memory_space<vmem>>, %arg3: memref<1x128xf32, #tpu.memory_space<vmem>>, %arg4: memref<128x128xf32, #tpu.memory_space<vmem>>, %arg5: memref<1x128xf32, #tpu.memory_space<vmem>>, %arg6: memref<8x128xf32, #tpu.memory_space<vmem>>) attributes {dimension_semantics = [#tpu.dimension_semantics<parallel>], iteration_bounds = array<i64: 2>, scalar_prefetch = 0 : i64, scratch_operands = 0 : i64, tpu.core_type = #tpu.core_type<tc>, window_params = [{transform_indices = @transform_0, window_bounds = array<i64: 8, 128>}, {pipeline_mode = #tpu.pipeline_mode<synchronous>, transform_indices = @transform_1, window_bounds = array<i64: 128, 128>}, {pipeline_mode = #tpu.pipeline_mode<synchronous>, transform_indices = @transform_2, window_bounds = array<i64: 1, 128>}, {pipeline_mode = #tpu.pipeline_mode<synchronous>, transform_indices = @transform_3, window_bounds = array<i64: 128, 128>}, {pipeline_mode = #tpu.pipeline_mode<synchronous>, transform_indices = @transform_4, window_bounds = array<i64: 1, 128>}, {transform_indices = @transform_5, window_bounds = array<i64: 8, 128>}]} {
    %c0 = arith.constant 0 : index
    %c0_0 = arith.constant 0 : index
    %0 = vector.load %arg1[%c0, %c0_0] : memref<8x128xf32, #tpu.memory_space<vmem>>, vector<8x128xf32>
    %c0_1 = arith.constant 0 : index
    %c0_2 = arith.constant 0 : index
    %1 = vector.load %arg2[%c0_1, %c0_2] : memref<128x128xf32, #tpu.memory_space<vmem>>, vector<128x128xf32>
    %cst = arith.constant dense<0.000000e+00> : vector<8x128xf32>
    %2 = tpu.matmul %0, %1, %cst {dimension_numbers = #tpu.dot_dimension_numbers<[1], [0], [0], [1], [0, 0, 1, 1], [], []>} : vector<8x128xf32>, vector<128x128xf32>, vector<8x128xf32> -> vector<8x128xf32>
    %c0_3 = arith.constant 0 : index
    %c0_4 = arith.constant 0 : index
    %3 = vector.load %arg3[%c0_3, %c0_4] : memref<1x128xf32, #tpu.memory_space<vmem>>, vector<1x128xf32>
    %4 = vector.broadcast %3 : vector<1x128xf32> to vector<8x128xf32>
    %5 = arith.addf %2, %4 : vector<8x128xf32>
    %cst_5 = arith.constant 0.000000e+00 : f32
    %6 = vector.broadcast %cst_5 : f32 to vector<8x128xf32>
    %7 = arith.maximumf %5, %6 : vector<8x128xf32>
    %c0_6 = arith.constant 0 : index
    %c0_7 = arith.constant 0 : index
    %8 = vector.load %arg4[%c0_6, %c0_7] : memref<128x128xf32, #tpu.memory_space<vmem>>, vector<128x128xf32>
    %cst_8 = arith.constant dense<0.000000e+00> : vector<8x128xf32>
    %9 = tpu.matmul %7, %8, %cst_8 {dimension_numbers = #tpu.dot_dimension_numbers<[1], [0], [0], [1], [0, 0, 1, 1], [], []>} : vector<8x128xf32>, vector<128x128xf32>, vector<8x128xf32> -> vector<8x128xf32>
    %c0_9 = arith.constant 0 : index
    %c0_10 = arith.constant 0 : index
    %10 = vector.load %arg5[%c0_9, %c0_10] : memref<1x128xf32, #tpu.memory_space<vmem>>, vector<1x128xf32>
    %11 = vector.broadcast %10 : vector<1x128xf32> to vector<8x128xf32>
    %12 = arith.addf %9, %11 : vector<8x128xf32>
    %cst_11 = arith.constant dense<0xFF800000> : vector<8xf32>
    %13 = vector.multi_reduction <maximumf>, %12, %cst_11 [1] : vector<8x128xf32> to vector<8xf32>
    %14 = vector.shape_cast %13 : vector<8xf32> to vector<8x1xf32>
    %15 = vector.broadcast %14 : vector<8x1xf32> to vector<8x128xf32>
    %16 = arith.subf %12, %15 : vector<8x128xf32>
    %17 = math.exp %16 : vector<8x128xf32>
    %cst_12 = arith.constant dense<0.000000e+00> : vector<8xf32>
    %18 = vector.multi_reduction <add>, %17, %cst_12 [1] : vector<8x128xf32> to vector<8xf32>
    %19 = vector.shape_cast %18 : vector<8xf32> to vector<8x1xf32>
    %20 = math.log %19 : vector<8x1xf32>
    %21 = vector.broadcast %20 : vector<8x1xf32> to vector<8x128xf32>
    %22 = arith.subf %16, %21 : vector<8x128xf32>
    %c0_13 = arith.constant 0 : index
    %c0_14 = arith.constant 0 : index
    %23 = vector.load %arg6[%c0_13, %c0_14] : memref<8x128xf32, #tpu.memory_space<vmem>>, vector<8x128xf32>
    tpu.vector_store %arg6[%c0_13, %c0_14], %22 {strides = array<i32>} : memref<8x128xf32, #tpu.memory_space<vmem>>, vector<8x128xf32>,
    return
  }
  func.func @transform_0(%arg0: i32) -> (i32, i32) {
    %c0_i32 = arith.constant 0 : i32
    %c0_i32_0 = arith.constant 0 : i32
    return %arg0, %c0_i32 : i32, i32
  }
  func.func @transform_1(%arg0: i32) -> (i32, i32) {
    %c0_i32 = arith.constant 0 : i32
    %c0_i32_0 = arith.constant 0 : i32
    %c0_i32_1 = arith.constant 0 : i32
    return %c0_i32, %c0_i32_0 : i32, i32
  }
  func.func @transform_2(%arg0: i32) -> (i32, i32) {
    %c0_i32 = arith.constant 0 : i32
    %c0_i32_0 = arith.constant 0 : i32
    %c0_i32_1 = arith.constant 0 : i32
    return %c0_i32, %c0_i32_0 : i32, i32
  }
  func.func @transform_3(%arg0: i32) -> (i32, i32) {
    %c0_i32 = arith.constant 0 : i32
    %c0_i32_0 = arith.constant 0 : i32
    %c0_i32_1 = arith.constant 0 : i32
    return %c0_i32, %c0_i32_0 : i32, i32
  }
  func.func @transform_4(%arg0: i32) -> (i32, i32) {
    %c0_i32 = arith.constant 0 : i32
    %c0_i32_0 = arith.constant 0 : i32
    %c0_i32_1 = arith.constant 0 : i32
    return %c0_i32, %c0_i32_0 : i32, i32
  }
  func.func @transform_5(%arg0: i32) -> (i32, i32) {
    %c0_i32 = arith.constant 0 : i32
    %c0_i32_0 = arith.constant 0 : i32
    return %arg0, %c0_i32 : i32, i32
  }
}

</mosaic_0001>

<bundles_post_ra>
// kernel: tpu_custom_call.1
= control target key start
LH: loop header
LB: loop body
LE: loop exit
PB: predicated region body
PF: predicated region fallthrough
CT: control target
= control target key end

     0   :  { %10 = vsyncpa [#allocation3], 0  ;;  %s1272_s0 = inlined_call_operand.hbm [shape: f32[16,128], index: 0, kind: input, shape index: {}]   ;;  %s1273_s1 = inlined_call_operand.hbm [shape: f32[128,128], index: 1, kind: input, shape index: {}]   ;;  %s1274_s2 = inlined_call_operand.vmem [shape: f32[1,128], index: 2, kind: input, shape index: {}]   ;;  %s1275_s3 = inlined_call_operand.hbm [shape: f32[128,128], index: 3, kind: input, shape index: {}]   ;;  %s1276_s4 = inlined_call_operand.vmem [shape: f32[1,128], index: 4, kind: input, shape index: {}]   ;;  %s1277_s5 = inlined_call_operand.hbm [shape: f32[16,128], index: 5, kind: output, shape index: {}]  }
   0x1   :  { %12 = vsyncpa [#allocation3 + $0x1], 0 }
   0x2   :  { %13 = vsyncpa [#allocation6], 0 }
   0x3   :  { %14 = vsyncpa [#allocation4], 0 }
   0x4   :  { %16 = vsyncpa [#allocation4 + $0x1], 0  ;;  %s1014_s18 = smov 0   ;;  %s1016_s19 = smov 0  }
   0x5   :  { %s1018_s20 = smov 0   ;;  %s1020_s21 = smov 0  }
   0x6 LB: > { %s1035_s22 = sadd.s32 4294967295, %s973_s21   ;;  %s571_s23 = sadd.s32 4294967294, %s973_s21   ;;  %s973_s21 = sphi %s1020_s21, %s1297_s21   ;;  %s969_s20 = sphi %s1018_s20, %s1296_s20   ;;  %s965_s19 = sphi %s1016_s19, %s1295_s19   ;;  %s961_s18 = sphi %s1014_s18, %s1294_s18  }
   0x7   : > { %p42_p0 = scmp.ne.s32.totalorder %s965_s19, %s961_s18  ;;  %p1278_p1 = scmp.eq.s32.totalorder %s1035_s22, 0 }
   0x8   : > { %p156_p3 = scmp.eq.s32.totalorder %s571_s23, 1  ;;  %p572_p5 = scmp.ge.s32.totalorder %s973_s21, 1 }
   0x9   : > { %p1044_p4 = por %p1278_p1, %p42_p0  ;;  %p163_p7 = scmp.lt.s32.totalorder %s973_s21, 3 }
   0xa   : > { %p1049_p6 = por %p156_p3, %p42_p0  ;;  %s975_s27 = smov [#allocation5]  }
   0xb   : > { %s1281_s24 = scalar_select %p1044_p4, 1, 0 }
   0xc   : > { %s1282_s25 = scalar_select %p1049_p6, 1, 0 }
   0xd   : > { %p1054_p8 = pnand %p572_p5, %p163_p7  ;;  %s175_s28 = sshll.u32 %s975_s27, 4  ;;  %s1058_s28 = int_to_ptr.vmem [resolvable:$true] %s175_s28 }
   0xe   : > { %s976_s30 = smov [#allocation7]   ;;  %s817_s9 = scalar_lea.hbm %s1273_s1, 2048 }
   0xf   : > { %p753_p9 = pneg %p1054_p8  ;;  %s191_s6 = sshll.u32 %s976_s30, 4  ;;  %s1069_s6 = int_to_ptr.vmem [resolvable:$true] %s191_s6 }
  0x10   : > { %p818_p12 = scmp.ne.s32.totalorder %s1273_s1, %s817_s9  ;;  %p824_p5 = scmp.lt.u32.totalorder %s817_s9, %s1273_s1 }
  0x11   : > { %p1065_p11 = pnand %p753_p9, %p1278_p1 }
  0x13   : > { %p819_p13 = pneg %p1065_p11 }
  0x15   : > { %p820_p0 = pnand %p819_p13, %p818_p12 }
  0x17   : > { %p821_p3 = pneg %p820_p0 }
  0x19   : > { %p826_p7 = pnand %p824_p5, %p821_p3 }
  0x1b   : > { %829 = shalt.err (!%p826_p7)
}
  0x1c   : > { %s830_s14 = scalar_lea.vmem %s1058_s28, 2048  ;;  %p838_p2 = scmp.lt.s32.totalorder %s1058_s28, %s1058_s28 }
  0x1d   : > { %p831_p9 = scmp.ne.s32.totalorder %s1058_s28, %s830_s14  ;;  %p839_p12 = scmp.lt.s32.totalorder %s830_s14, %s830_s14 }
  0x1f   : > { %p833_p10 = pnand %p831_p9, %p819_p13  ;;  %p840_p0 = por %p839_p12, %p838_p2 }
  0x21   : > { %p834_p1 = pneg %p833_p10 }
  0x23   : > { %p841_p6 = pnand %p840_p0, %p834_p1 }
  0x25   : > { %844 = shalt.err (!%p841_p6)
}
  0x26   : > { %s977_s15 = smov 128   ;;  %s978_s16 = smov 8  }
  0x27   : > { %756 = dma.hbm_to_vmem [thread:$0]  (!%p1065_p11), %s1273_s1, 2048, %s1058_s28, [#allocation6], %s977_s15, %s977_s15, %s978_s16  }
  0x28   : > { %s845_s7 = scalar_lea.hbm %s1275_s3, 2048 }
  0x29   : > { %p846_p2 = scmp.ne.s32.totalorder %s1275_s3, %s845_s7  ;;  %p852_p10 = scmp.lt.u32.totalorder %s845_s7, %s1275_s3 }
  0x2b   : > { %p848_p1 = pnand %p846_p2, %p819_p13 }
  0x2d   : > { %p849_p6 = pneg %p848_p1 }
  0x2f   : > { %p854_p3 = pnand %p852_p10, %p849_p6 }
  0x31   : > { %857 = shalt.err (!%p854_p3)
}
  0x32   : > { %s858_s28 = scalar_lea.vmem %s1069_s6, 2048  ;;  %p866_p12 = scmp.lt.s32.totalorder %s1069_s6, %s1069_s6 }
  0x33   : > { %p859_p5 = scmp.ne.s32.totalorder %s1069_s6, %s858_s28  ;;  %p867_p0 = scmp.lt.s32.totalorder %s858_s28, %s858_s28 }
  0x35   : > { %p861_p7 = pnand %p859_p5, %p819_p13  ;;  %p868_p2 = por %p867_p0, %p866_p12 }
  0x37   : > { %p862_p9 = pneg %p861_p7 }
  0x39   : > { %p869_p1 = pnand %p868_p2, %p862_p9 }
  0x3b   : > { %872 = shalt.err (!%p869_p1)
}
  0x3c   : > { %759 = dma.hbm_to_vmem [thread:$0]  (!%p1065_p11), %s1275_s3, 2048, %s1069_s6, [#allocation6], %s977_s15, %s977_s15, %s978_s16  }
  0x3d   : > { %s1124_s14 = sadd.s32 1, %s973_s21   ;;  %s29_s29 = sadd.s32 1, %s969_s20 }
  0x3e   : > { %s26_s17 = ssub.s32 %s973_s21, %s1124_s14  ;;  %p36_p13 = scmp.ne.s32.totalorder %s969_s20, %s965_s19 }
  0x3f   : > { %p27_p6 = scmp.eq.s32.totalorder %s26_s17, 0  ;;  %p37_p10 = scmp.eq.s32.totalorder %s973_s21, 0 }
  0x40   : > { %p1285_p3 = scmp.eq.s32.totalorder %s1035_s22, 1  ;;  %p770_p7 = scmp.lt.s32.totalorder %s973_s21, 2 }
  0x41   : > { %s1140_s27 = scalar_select %p27_p6, %s969_s20, %s29_s29  }
  0x42   : > { %p1134_p5 = por %p1285_p3, %p36_p13  ;;  %p38_p9 = por %p37_p10, %p36_p13 }
  0x43   : > { %s208_s30 = sand.u32 1, %s969_s20   ;;  %s577_s6 = sshll.u32 %s973_s21, 7 }
  0x44   : > { %s1286_s23 = scalar_select %p1134_p5, 1, 0 }
  0x45   : > { %s576_s7 = sshll.u32 %s208_s30, 3  ;;  %s1147_s8 = scalar_lea.hbm %s1272_s0, %s577_s6 }
  0x46   : > { %s212_s9 = scalar_lea.vmem [#allocation2], %s576_s7  ;;  %p1151_p11 = pnand %p770_p7, %p38_p9 }
  0x47   : > { %s219_s10 = sshll.u32 %s212_s9, 4  ;;  %s209_s28 = scalar_lea.sflag [#allocation3], %s208_s30  ;;  %s1149_s10 = int_to_ptr.vmem [resolvable:$true] %s219_s10 }
  0x48   : > { %s873_s12 = scalar_lea.hbm %s1147_s8, 128  ;;  %p875_p0 = pneg %p1151_p11 }
  0x49   : > { %p874_p12 = scmp.ne.s32.totalorder %s1147_s8, %s873_s12  ;;  %s878_s17 = scalar_lea.hbm %s1272_s0, 256 }
  0x4a   : > { %p879_p13 = scmp.lt.u32.totalorder %s1147_s8, %s1272_s0  ;;  %p880_p6 = scmp.lt.u32.totalorder %s878_s17, %s873_s12 }
  0x4b   : > { %p876_p2 = pnand %p875_p0, %p874_p12  ;;  %p882_p3 = scmp.lt.u32.totalorder %s873_s12, %s1147_s8 }
  0x4c   : > { %p881_p10 = por %p880_p6, %p879_p13 }
  0x4d   : > { %p877_p1 = pneg %p876_p2 }
  0x4e   : > { %p883_p7 = por %p882_p3, %p881_p10 }
  0x50   : > { %p884_p9 = pnand %p883_p7, %p877_p1 }
  0x52   : > { %887 = shalt.err (!%p884_p9)
}
  0x53   : > { %s888_s30 = scalar_lea.vmem %s1149_s10, 128  ;;  %s979_s15 = smov [#allocation2]  }
  0x54   : > { %p889_p12 = scmp.ne.s32.totalorder %s1149_s10, %s888_s30  ;;  %s893_s16 = sshll.u32 %s979_s15, 4  ;;  %s894_s16 = int_to_ptr.vmem [resolvable:$false] %s893_s16 }
  0x55   : > { %s895_s9 = scalar_lea.vmem %s894_s16, 256  ;;  %p896_p4 = scmp.lt.s32.totalorder %s1149_s10, %s894_s16 }
  0x56   : > { %p891_p2 = pnand %p889_p12, %p875_p0  ;;  %p897_p13 = scmp.lt.s32.totalorder %s895_s9, %s888_s30 }
  0x58   : > { %p892_p5 = pneg %p891_p2  ;;  %p898_p6 = por %p897_p13, %p896_p4 }
  0x5a   : > { %p899_p10 = pnand %p898_p6, %p892_p5 }
  0x5c   : > { %902 = shalt.err (!%p899_p10)
}
  0x5d   : > { %763 = dma.hbm_to_vmem [thread:$0]  (!%p1151_p11), %s1147_s8, 128, %s1149_s10, %s209_s28  }
  0x5e   : > { %228 = sbr.rel (%p1054_p8) target bundleno = 897 (0x381), region = 40  ;;  %s1183_s12 = sand.u32 (!%p1054_p8), 1, %s965_s19  }
  0x5f   : > { %s579_s13 = sshll.u32 (!%p1054_p8), %s1183_s12, 3  ;;  %s231_s29 = scalar_lea.sflag (!%p1054_p8), [#allocation3], %s1183_s12 }
  0x60   : > { %s1189_s17 = scalar_lea.vmem (!%p1054_p8), [#allocation2], %s579_s13  ;;  %p1288_p4 = scmp.ne.s32.totalorder (!%p1054_p8), %s1281_s24, 0 }
  0x65   : > { %948 = dma.done.wait (%p1288_p4), %s231_s29, 128  }
  0x66   : > { %950 = vsyncadd (%p1288_p4), %s231_s29, 4294967168  ;;  %p1289_p5 = scmp.eq.s32.totalorder %s1035_s22, 0 }
  0x68   : > { %952 = dma.done.wait (%p1289_p5), [#allocation6], 4096   ;;  %p1290_p8 = pmov %p1289_p5 }
  0x69   : > { %v980_v0 = vmov 0.0|0.0   ;;  %vm981_vm0 = vmmov 0   ;;  %v982_v1 = vmov 0.0   ;;  %v270_v2 = vld [vmem:[#allocation5] sm:$0xff]  ;;  %v271_v3 = vld [vmem:[#allocation5 + $0x8] sm:$0xff]  ;;  %v272_v4 = vld [vmem:[#allocation5 + $0x10] sm:$0xff] }
  0x6a   : > { %954 = vsyncadd (%p1290_p8), [#allocation6], 4294963200  ;;  %693 = vmatprep.subr.bf16.mxu0 %v980_v0  ;;  %655 = vmatprep.mubr.msk.f32.mxu0 %vm981_vm0, %v982_v1  ;;  %v694_v5 = vpack.c.bf16 %v271_v3, %v270_v2  ;;  %v273_v6 = vld [vmem:[#allocation5 + $0x18] sm:$0xff]  ;;  %v274_v8 = vld [vmem:[#allocation5 + $0x20] sm:$0xff]  ;;  %s586_s11 = sshll.u32 %s1035_s22, 7  ;;  %s268_s28 = scalar_lea.vmem [#allocation8], %s579_s13 }
  0x6b   : > { %717 = vmatprep.subr.bf16.mxu1 %v980_v0  ;;  %690 = vmatprep.mubr.msk.f32.mxu1 %vm981_vm0, %v982_v1  ;;  %v697_v7 = vpack.c.bf16 %v273_v6, %v272_v4  ;;  %v275_v9 = vld [vmem:[#allocation5 + $0x28] sm:$0xff]  ;;  %v364_v10 = vld [vmem:[#allocation7] sm:$0xff]  ;;  %v366_v12 = vld [vmem:[#allocation7 + $0x10] sm:$0xff]  ;;  %s482_s7 = sshll.u32 %s268_s28, 4  ;;  %s1228_s15 = scalar_lea.hbm %s1277_s5, %s586_s11  ;;  %s1230_s7 = int_to_ptr.vmem [resolvable:$true] %s482_s7 }
  0x6c   : > { %695 = vmatpush3.bf16.msra.mxu0 %v694_v5  ;;  %v365_v11 = vld [vmem:[#allocation7 + $0x8] sm:$0xff]  ;;  %v367_v13 = vld [vmem:[#allocation7 + $0x18] sm:$0xff]  ;;  %v700_v14 = vpack.c.bf16 %v275_v9, %v274_v8  ;;  %v276_v16 = vld [vmem:[#allocation5 + $0x30] sm:$0xff]  ;;  %s469_s16 = scalar_lea.sflag [#allocation4], %s1183_s12  ;;  %s903_s9 = scalar_lea.vmem %s1230_s7, 128 }
  0x6d   : > { %696 = vmatprep.subr.bf16.mxu0 %v980_v0  ;;  %v718_v15 = vpack.c.bf16 %v365_v11, %v364_v10  ;;  %v277_v17 = vld [vmem:[#allocation5 + $0x38] sm:$0xff]  ;;  %v721_v18 = vpack.c.bf16 %v367_v13, %v366_v12  ;;  %v368_v19 = vld [vmem:[#allocation7 + $0x20] sm:$0xff]  ;;  %v369_v20 = vld [vmem:[#allocation7 + $0x28] sm:$0xff]  ;;  %p904_p11 = scmp.ne.s32.totalorder %s1230_s7, %s903_s9  ;;  %p1291_p0 = scmp.ne.s32.totalorder %s1286_s23, 0 }
  0x6e   : > { %v703_v21 = vpack.c.bf16 %v277_v17, %v276_v16  ;;  %v278_v22 = vld [vmem:[#allocation5 + $0x40] sm:$0xff]  ;;  %v279_v23 = vld [vmem:[#allocation5 + $0x48] sm:$0xff]  ;;  %v724_v24 = vpack.c.bf16 %v369_v20, %v368_v19  ;;  %v370_v25 = vld [vmem:[#allocation7 + $0x30] sm:$0xff]  ;;  %s983_s22 = smov [#allocation8]  }
  0x6f   : > { %719 = vmatpush3.bf16.msra.mxu1 %v718_v15  ;;  %v371_v26 = vld [vmem:[#allocation7 + $0x38] sm:$0xff]  ;;  %v706_v27 = vpack.c.bf16 %v279_v23, %v278_v22  ;;  %v280_v28 = vld [vmem:[#allocation5 + $0x50] sm:$0xff]  ;;  %v372_v31 = vld [vmem:[#allocation7 + $0x40] sm:$0xff]  ;;  %p905_p1 = pnand %p904_p11, %p1291_p0  ;;  %s907_s13 = sshll.u32 %s983_s22, 4  ;;  %s908_s13 = int_to_ptr.vmem [resolvable:$false] %s907_s13 }
  0x70   : > { %698 = vmatpush3.bf16.msra.mxu0 %v697_v7  ;;  %720 = vmatprep.subr.bf16.mxu1 %v980_v0  ;;  %v281_v29 = vld [vmem:[#allocation5 + $0x58] sm:$0xff]  ;;  %v727_v30 = vpack.c.bf16 %v371_v26, %v370_v25  ;;  %v373_v32 = vld [vmem:[#allocation7 + $0x48] sm:$0xff]  ;;  %v282_v34 = vld [vmem:[#allocation5 + $0x60] sm:$0xff]  ;;  %s909_s29 = scalar_lea.vmem %s908_s13, 256  ;;  %p910_p7 = scmp.lt.s32.totalorder %s1230_s7, %s908_s13 }
  0x71   : > { %699 = vmatprep.subr.bf16.mxu0 %v980_v0  ;;  %v709_v33 = vpack.c.bf16 %v281_v29, %v280_v28  ;;  %v283_v35 = vld [vmem:[#allocation5 + $0x68] sm:$0xff]  ;;  %v730_v36 = vpack.c.bf16 %v373_v32, %v372_v31  ;;  %v374_v37 = vld [vmem:[#allocation7 + $0x50] sm:$0xff]  ;;  %v375_v38 = vld [vmem:[#allocation7 + $0x58] sm:$0xff]  ;;  %p906_p3 = pneg %p905_p1  ;;  %p911_p9 = scmp.lt.s32.totalorder %s909_s29, %s903_s9 }
  0x72   : > { %v712_v39 = vpack.c.bf16 %v283_v35, %v282_v34  ;;  %v284_v40 = vld [vmem:[#allocation5 + $0x70] sm:$0xff]  ;;  %v285_v41 = vld [vmem:[#allocation5 + $0x78] sm:$0xff]  ;;  %v733_v42 = vpack.c.bf16 %v375_v38, %v374_v37  ;;  %v376_v43 = vld [vmem:[#allocation7 + $0x60] sm:$0xff] }
  0x73   : > { %722 = vmatpush3.bf16.msra.mxu1 %v721_v18  ;;  %v377_v44 = vld [vmem:[#allocation7 + $0x68] sm:$0xff]  ;;  %v715_v45 = vpack.c.bf16 %v285_v41, %v284_v40  ;;  %v269_v47 = vld [vmem:[%s1189_s17] sm:$0xff]  ;;  %p912_p12 = por %p911_p9, %p910_p7 }
  0x74   : > { %701 = vmatpush3.bf16.msra.mxu0 %v700_v14  ;;  %723 = vmatprep.subr.bf16.mxu1 %v980_v0  ;;  %v736_v46 = vpack.c.bf16 %v377_v44, %v376_v43  ;;  %v378_v48 = vld [vmem:[#allocation7 + $0x70] sm:$0xff]  ;;  %v379_v49 = vld [vmem:[#allocation7 + $0x78] sm:$0xff] }
  0x75   : > { %702 = vmatprep.subr.bf16.mxu0 %v980_v0  ;;  %v739_v50 = vpack.c.bf16 %v379_v49, %v378_v48  ;;  %v583_v51 = vld [vmem:[%s1274_s2] ss:$0 sm:$0xff]  ;;  %p913_p2 = pnand %p912_p12, %p906_p3 }
  0x76   : > { %v584_v56 = vld [vmem:[%s1276_s4] ss:$0 sm:$0xff] }
  0x77   : > { %725 = vmatpush3.bf16.msra.mxu1 %v724_v24 }
  0x78   : > { %704 = vmatpush3.bf16.msra.mxu0 %v703_v21  ;;  %726 = vmatprep.subr.bf16.mxu1 %v980_v0 }
  0x79   : > { %705 = vmatprep.subr.bf16.mxu0 %v980_v0 }
  0x7b   : > { %728 = vmatpush3.bf16.msra.mxu1 %v727_v30 }
  0x7c   : > { %707 = vmatpush3.bf16.msra.mxu0 %v706_v27  ;;  %729 = vmatprep.subr.bf16.mxu1 %v980_v0 }
  0x7d   : > { %708 = vmatprep.subr.bf16.mxu0 %v980_v0 }
  0x7f   : > { %731 = vmatpush3.bf16.msra.mxu1 %v730_v36 }
  0x80   : > { %710 = vmatpush3.bf16.msra.mxu0 %v709_v33  ;;  %732 = vmatprep.subr.bf16.mxu1 %v980_v0 }
  0x81   : > { %711 = vmatprep.subr.bf16.mxu0 %v980_v0 }
  0x83   : > { %734 = vmatpush3.bf16.msra.mxu1 %v733_v42 }
  0x84   : > { %713 = vmatpush3.bf16.msra.mxu0 %v712_v39  ;;  %735 = vmatprep.subr.bf16.mxu1 %v980_v0 }
  0x85   : > { %714 = vmatprep.subr.bf16.mxu0 %v980_v0 }
  0x87   : > { %737 = vmatpush3.bf16.msra.mxu1 %v736_v46 }
  0x88   : > { %716 = vmatpush3.bf16.msra.mxu0 %v715_v45  ;;  %738 = vmatprep.subr.bf16.mxu1 %v980_v0 }
  0x8b   : > { %656 = vmatmul.mubr.f32.vlgmr.msra.gmra.mrb[0].mxu0 %v269_v47  ;;  %740 = vmatpush3.bf16.msra.mxu1 %v739_v50 }
 0x15e   : > { %v359_v52 = vpop.f32.mrb[0].mxu0 }
 0x15f   : > { %v360_v53 = vadd.f32 %v583_v51, %v359_v52  ;;  %v657_v54 = vpop.f32.mrb[1].mxu0 }
 0x161   : > { %v363_v55 = vmax.f32 %v360_v53, 0.0 }
 0x163   : > { %691 = vmatmul.mubr.f32.vlgmr.msra.gmra.mrb[0].mxu1 %v363_v55 }
 0x236   : > { %v453_v57 = vpop.f32.mrb[0].mxu1 }
 0x237   : > { %v454_v58 = vadd.f32 %v584_v56, %v453_v57  ;;  %v692_v59 = vpop.f32.mrb[1].mxu1 }
 0x239   : > { %457 = vmax.xlane.f32.xlu0 %v454_v58 }
 0x2c6   : > { %v458_v60 = vpop.xlane.xlu0 %457 }
 0x2c7   : > { %v459_v61 = vsub.f32 %v454_v58, %v458_v60 }
 0x2c9   : > { %v460_v62 = vmul.f32 1.442695, %v459_v61 }
 0x2cb   : > { %813 = vpow2.f32 %v460_v62 }
 0x2d5   : > { %v814_v63 = vpop.eup %813 }
 0x2d6   : > { %462 = vadd.xlane.f32.xlu0 %v814_v63 }
 0x363   : > { %v463_v0 = vpop.xlane.xlu0 %462 }
 0x364   : > { %815 = vlog2.f32 %v463_v0 }
 0x36e   : > { %v816_v1 = vpop.eup %815 }
 0x36f   : > { %v465_v2 = vmul.f32 0.6931472, %v816_v1 }
 0x371   : > { %v466_v3 = vsub.f32 %v459_v61, %v465_v2 }
 0x373   : > { %467 = vst [vmem:[%s268_s28] sm:$0xff] %v466_v3 }
 0x374   : > { %916 = shalt.err (!%p913_p2)
}
 0x375   : > { %s917_s12 = scalar_lea.hbm %s1228_s15, 128  ;;  %s921_s26 = scalar_lea.hbm %s1277_s5, 256 }
 0x376   : > { %p918_p13 = scmp.ne.s32.totalorder %s1228_s15, %s917_s12  ;;  %p922_p4 = scmp.lt.u32.totalorder %s1228_s15, %s1277_s5 }
 0x377   : > { %p923_p5 = scmp.lt.u32.totalorder %s921_s26, %s917_s12  ;;  %p925_p11 = scmp.lt.u32.totalorder %s917_s12, %s1228_s15 }
 0x378   : > { %p919_p6 = pnand %p918_p13, %p1291_p0 }
 0x379   : > { %p924_p8 = por %p923_p5, %p922_p4 }
 0x37a   : > { %p920_p10 = pneg %p919_p6 }
 0x37b   : > { %p926_p1 = por %p925_p11, %p924_p8 }
 0x37d   : > { %p927_p3 = pnand %p926_p1, %p920_p10 }
 0x37f   : > { %930 = shalt.err (!%p927_p3)
}
 0x380   : > { %751 = dma.vmem_to_hbm [thread:$0]  (%p1291_p0), %s1230_s7, 128, %s1228_s15, %s469_s16  }
 0x381 PF: > { %s494_s11 = sand.u32 1, %s961_s18   ;;  %p1292_p7 = scmp.ne.s32.totalorder %s1282_s25, 0 }
 0x382   : > { %p1293_p9 = scmp.ge.s32.totalorder %s973_s21, 2  ;;  %s495_s28 = scalar_lea.sflag [#allocation4], %s494_s11 }
 0x384   : > { %p765_p12 = pnand %p1293_p9, %p1292_p7 }
 0x386   : > { %956 = dma.done.wait (!%p765_p12), %s495_s28, 128  }
 0x387   : > { %958 = vsyncadd (!%p765_p12), %s495_s28, 4294967168  ;;  %p19_p2 = scmp.ge.s32.totalorder %s1124_s14, 4   ;;  %s1294_s18 = smov %s965_s19 }
 0x388   : > { %s1295_s19 = smov %s969_s20  ;;  %s1296_s20 = smov %s1140_s27 }
 0x389   : > { %s1297_s21 = smov %s1124_s14  ;;  %21 = sbr.rel (!%p19_p2) target bundleno = 6 (0x6), region = 93 }
 0x390   :  { %500 = vsyncpa [#allocation3], 1 }
 0x391   :  { %502 = vsyncpa [#allocation3 + $0x1], 1 }
 0x392   :  { %503 = vsyncpa [#allocation6], 1 }
 0x393   :  { %504 = vsyncpa [#allocation4], 1 }
 0x394   :  { %506 = vsyncpa [#allocation4 + $0x1], 1 }

// kernel: tpu_custom_call.1
= control target key start
LH: loop header
LB: loop body
LE: loop exit
PB: predicated region body
PF: predicated region fallthrough
CT: control target
= control target key end

     0   :  { %10 = vsyncpa [#allocation3], 0  ;;  %s1272_s0 = inlined_call_operand.hbm [shape: f32[16,128], index: 0, kind: input, shape index: {}]   ;;  %s1273_s1 = inlined_call_operand.hbm [shape: f32[128,128], index: 1, kind: input, shape index: {}]   ;;  %s1274_s2 = inlined_call_operand.vmem [shape: f32[1,128], index: 2, kind: input, shape index: {}]   ;;  %s1275_s3 = inlined_call_operand.hbm [shape: f32[128,128], index: 3, kind: input, shape index: {}]   ;;  %s1276_s4 = inlined_call_operand.vmem [shape: f32[1,128], index: 4, kind: input, shape index: {}]   ;;  %s1277_s5 = inlined_call_operand.hbm [shape: f32[16,128], index: 5, kind: output, shape index: {}]  }
   0x1   :  { %12 = vsyncpa [#allocation3 + $0x1], 0 }
   0x2   :  { %13 = vsyncpa [#allocation6], 0 }
   0x3   :  { %14 = vsyncpa [#allocation4], 0 }
   0x4   :  { %16 = vsyncpa [#allocation4 + $0x1], 0  ;;  %s1014_s18 = smov 0   ;;  %s1016_s19 = smov 0  }
   0x5   :  { %s1018_s20 = smov 0   ;;  %s1020_s21 = smov 0  }
   0x6 LB: > { %s1035_s22 = sadd.s32 4294967295, %s973_s21   ;;  %s571_s23 = sadd.s32 4294967294, %s973_s21   ;;  %s973_s21 = sphi %s1020_s21, %s1297_s21   ;;  %s969_s20 = sphi %s1018_s20, %s1296_s20   ;;  %s965_s19 = sphi %s1016_s19, %s1295_s19   ;;  %s961_s18 = sphi %s1014_s18, %s1294_s18  }
   0x7   : > { %p42_p0 = scmp.ne.s32.totalorder %s965_s19, %s961_s18  ;;  %p1278_p1 = scmp.eq.s32.totalorder %s1035_s22, 0 }
   0x8   : > { %p156_p3 = scmp.eq.s32.totalorder %s571_s23, 1  ;;  %p572_p5 = scmp.ge.s32.totalorder %s973_s21, 1 }
   0x9   : > { %p1044_p4 = por %p1278_p1, %p42_p0  ;;  %p163_p7 = scmp.lt.s32.totalorder %s973_s21, 3 }
   0xa   : > { %p1049_p6 = por %p156_p3, %p42_p0  ;;  %s975_s27 = smov [#allocation5]  }
   0xb   : > { %s1281_s24 = scalar_select %p1044_p4, 1, 0 }
   0xc   : > { %s1282_s25 = scalar_select %p1049_p6, 1, 0 }
   0xd   : > { %p1054_p8 = pnand %p572_p5, %p163_p7  ;;  %s175_s28 = sshll.u32 %s975_s27, 4  ;;  %s1058_s28 = int_to_ptr.vmem [resolvable:$true] %s175_s28 }
   0xe   : > { %s976_s30 = smov [#allocation7]   ;;  %s817_s9 = scalar_lea.hbm %s1273_s1, 2048 }
   0xf   : > { %p753_p9 = pneg %p1054_p8  ;;  %s191_s6 = sshll.u32 %s976_s30, 4  ;;  %s1069_s6 = int_to_ptr.vmem [resolvable:$true] %s191_s6 }
  0x10   : > { %p818_p12 = scmp.ne.s32.totalorder %s1273_s1, %s817_s9  ;;  %p824_p5 = scmp.lt.u32.totalorder %s817_s9, %s1273_s1 }
  0x11   : > { %p1065_p11 = pnand %p753_p9, %p1278_p1 }
  0x13   : > { %p819_p13 = pneg %p1065_p11 }
  0x15   : > { %p820_p0 = pnand %p819_p13, %p818_p12 }
  0x17   : > { %p821_p3 = pneg %p820_p0 }
  0x19   : > { %p826_p7 = pnand %p824_p5, %p821_p3 }
  0x1b   : > { %829 = shalt.err (!%p826_p7)
}
  0x1c   : > { %s830_s14 = scalar_lea.vmem %s1058_s28, 2048  ;;  %p838_p2 = scmp.lt.s32.totalorder %s1058_s28, %s1058_s28 }
  0x1d   : > { %p831_p9 = scmp.ne.s32.totalorder %s1058_s28, %s830_s14  ;;  %p839_p12 = scmp.lt.s32.totalorder %s830_s14, %s830_s14 }
  0x1f   : > { %p833_p10 = pnand %p831_p9, %p819_p13  ;;  %p840_p0 = por %p839_p12, %p838_p2 }
  0x21   : > { %p834_p1 = pneg %p833_p10 }
  0x23   : > { %p841_p6 = pnand %p840_p0, %p834_p1 }
  0x25   : > { %844 = shalt.err (!%p841_p6)
}
  0x26   : > { %s977_s15 = smov 128   ;;  %s978_s16 = smov 8  }
  0x27   : > { %756 = dma.hbm_to_vmem [thread:$0]  (!%p1065_p11), %s1273_s1, 2048, %s1058_s28, [#allocation6], %s977_s15, %s977_s15, %s978_s16  }
  0x28   : > { %s845_s7 = scalar_lea.hbm %s1275_s3, 2048 }
  0x29   : > { %p846_p2 = scmp.ne.s32.totalorder %s1275_s3, %s845_s7  ;;  %p852_p10 = scmp.lt.u32.totalorder %s845_s7, %s1275_s3 }
  0x2b   : > { %p848_p1 = pnand %p846_p2, %p819_p13 }
  0x2d   : > { %p849_p6 = pneg %p848_p1 }
  0x2f   : > { %p854_p3 = pnand %p852_p10, %p849_p6 }
  0x31   : > { %857 = shalt.err (!%p854_p3)
}
  0x32   : > { %s858_s28 = scalar_lea.vmem %s1069_s6, 2048  ;;  %p866_p12 = scmp.lt.s32.totalorder %s1069_s6, %s1069_s6 }
  0x33   : > { %p859_p5 = scmp.ne.s32.totalorder %s1069_s6, %s858_s28  ;;  %p867_p0 = scmp.lt.s32.totalorder %s858_s28, %s858_s28 }
  0x35   : > { %p861_p7 = pnand %p859_p5, %p819_p13  ;;  %p868_p2 = por %p867_p0, %p866_p12 }
  0x37   : > { %p862_p9 = pneg %p861_p7 }
  0x39   : > { %p869_p1 = pnand %p868_p2, %p862_p9 }
  0x3b   : > { %872 = shalt.err (!%p869_p1)
}
  0x3c   : > { %759 = dma.hbm_to_vmem [thread:$0]  (!%p1065_p11), %s1275_s3, 2048, %s1069_s6, [#allocation6], %s977_s15, %s977_s15, %s978_s16  }
  0x3d   : > { %s1124_s14 = sadd.s32 1, %s973_s21   ;;  %s29_s29 = sadd.s32 1, %s969_s20 }
  0x3e   : > { %s26_s17 = ssub.s32 %s973_s21, %s1124_s14  ;;  %p36_p13 = scmp.ne.s32.totalorder %s969_s20, %s965_s19 }
  0x3f   : > { %p27_p6 = scmp.eq.s32.totalorder %s26_s17, 0  ;;  %p37_p10 = scmp.eq.s32.totalorder %s973_s21, 0 }
  0x40   : > { %p1285_p3 = scmp.eq.s32.totalorder %s1035_s22, 1  ;;  %p770_p7 = scmp.lt.s32.totalorder %s973_s21, 2 }
  0x41   : > { %s1140_s27 = scalar_select %p27_p6, %s969_s20, %s29_s29  }
  0x42   : > { %p1134_p5 = por %p1285_p3, %p36_p13  ;;  %p38_p9 = por %p37_p10, %p36_p13 }
  0x43   : > { %s208_s30 = sand.u32 1, %s969_s20   ;;  %s577_s6 = sshll.u32 %s973_s21, 7 }
  0x44   : > { %s1286_s23 = scalar_select %p1134_p5, 1, 0 }
  0x45   : > { %s576_s7 = sshll.u32 %s208_s30, 3  ;;  %s1147_s8 = scalar_lea.hbm %s1272_s0, %s577_s6 }
  0x46   : > { %s212_s9 = scalar_lea.vmem [#allocation2], %s576_s7  ;;  %p1151_p11 = pnand %p770_p7, %p38_p9 }
  0x47   : > { %s219_s10 = sshll.u32 %s212_s9, 4  ;;  %s209_s28 = scalar_lea.sflag [#allocation3], %s208_s30  ;;  %s1149_s10 = int_to_ptr.vmem [resolvable:$true] %s219_s10 }
  0x48   : > { %s873_s12 = scalar_lea.hbm %s1147_s8, 128  ;;  %p875_p0 = pneg %p1151_p11 }
  0x49   : > { %p874_p12 = scmp.ne.s32.totalorder %s1147_s8, %s873_s12  ;;  %s878_s17 = scalar_lea.hbm %s1272_s0, 256 }
  0x4a   : > { %p879_p13 = scmp.lt.u32.totalorder %s1147_s8, %s1272_s0  ;;  %p880_p6 = scmp.lt.u32.totalorder %s878_s17, %s873_s12 }
  0x4b   : > { %p876_p2 = pnand %p875_p0, %p874_p12  ;;  %p882_p3 = scmp.lt.u32.totalorder %s873_s12, %s1147_s8 }
  0x4c   : > { %p881_p10 = por %p880_p6, %p879_p13 }
  0x4d   : > { %p877_p1 = pneg %p876_p2 }
  0x4e   : > { %p883_p7 = por %p882_p3, %p881_p10 }
  0x50   : > { %p884_p9 = pnand %p883_p7, %p877_p1 }
  0x52   : > { %887 = shalt.err (!%p884_p9)
}
  0x53   : > { %s888_s30 = scalar_lea.vmem %s1149_s10, 128  ;;  %s979_s15 = smov [#allocation2]  }
  0x54   : > { %p889_p12 = scmp.ne.s32.totalorder %s1149_s10, %s888_s30  ;;  %s893_s16 = sshll.u32 %s979_s15, 4  ;;  %s894_s16 = int_to_ptr.vmem [resolvable:$false] %s893_s16 }
  0x55   : > { %s895_s9 = scalar_lea.vmem %s894_s16, 256  ;;  %p896_p4 = scmp.lt.s32.totalorder %s1149_s10, %s894_s16 }
  0x56   : > { %p891_p2 = pnand %p889_p12, %p875_p0  ;;  %p897_p13 = scmp.lt.s32.totalorder %s895_s9, %s888_s30 }
  0x58   : > { %p892_p5 = pneg %p891_p2  ;;  %p898_p6 = por %p897_p13, %p896_p4 }
  0x5a   : > { %p899_p10 = pnand %p898_p6, %p892_p5 }
  0x5c   : > { %902 = shalt.err (!%p899_p10)
}
  0x5d   : > { %763 = dma.hbm_to_vmem [thread:$0]  (!%p1151_p11), %s1147_s8, 128, %s1149_s10, %s209_s28  }
  0x5e   : > { %228 = sbr.rel (%p1054_p8) target bundleno = 897 (0x381), region = 40  ;;  %s1183_s12 = sand.u32 (!%p1054_p8), 1, %s965_s19  }
  0x5f   : > { %s579_s13 = sshll.u32 (!%p1054_p8), %s1183_s12, 3  ;;  %s231_s29 = scalar_lea.sflag (!%p1054_p8), [#allocation3], %s1183_s12 }
  0x60   : > { %s1189_s17 = scalar_lea.vmem (!%p1054_p8), [#allocation2], %s579_s13  ;;  %p1288_p4 = scmp.ne.s32.totalorder (!%p1054_p8), %s1281_s24, 0 }
  0x65   : > { %948 = dma.done.wait (%p1288_p4), %s231_s29, 128  }
  0x66   : > { %950 = vsyncadd (%p1288_p4), %s231_s29, 4294967168  ;;  %p1289_p5 = scmp.eq.s32.totalorder %s1035_s22, 0 }
  0x68   : > { %952 = dma.done.wait (%p1289_p5), [#allocation6], 4096   ;;  %p1290_p8 = pmov %p1289_p5 }
  0x69   : > { %v980_v0 = vmov 0.0|0.0   ;;  %vm981_vm0 = vmmov 0   ;;  %v982_v1 = vmov 0.0   ;;  %v270_v2 = vld [vmem:[#allocation5] sm:$0xff]  ;;  %v271_v3 = vld [vmem:[#allocation5 + $0x8] sm:$0xff]  ;;  %v272_v4 = vld [vmem:[#allocation5 + $0x10] sm:$0xff] }
  0x6a   : > { %954 = vsyncadd (%p1290_p8), [#allocation6], 4294963200  ;;  %693 = vmatprep.subr.bf16.mxu0 %v980_v0  ;;  %655 = vmatprep.mubr.msk.f32.mxu0 %vm981_vm0, %v982_v1  ;;  %v694_v5 = vpack.c.bf16 %v271_v3, %v270_v2  ;;  %v273_v6 = vld [vmem:[#allocation5 + $0x18] sm:$0xff]  ;;  %v274_v8 = vld [vmem:[#allocation5 + $0x20] sm:$0xff]  ;;  %s586_s11 = sshll.u32 %s1035_s22, 7  ;;  %s268_s28 = scalar_lea.vmem [#allocation8], %s579_s13 }
  0x6b   : > { %717 = vmatprep.subr.bf16.mxu1 %v980_v0  ;;  %690 = vmatprep.mubr.msk.f32.mxu1 %vm981_vm0, %v982_v1  ;;  %v697_v7 = vpack.c.bf16 %v273_v6, %v272_v4  ;;  %v275_v9 = vld [vmem:[#allocation5 + $0x28] sm:$0xff]  ;;  %v364_v10 = vld [vmem:[#allocation7] sm:$0xff]  ;;  %v366_v12 = vld [vmem:[#allocation7 + $0x10] sm:$0xff]  ;;  %s482_s7 = sshll.u32 %s268_s28, 4  ;;  %s1228_s15 = scalar_lea.hbm %s1277_s5, %s586_s11  ;;  %s1230_s7 = int_to_ptr.vmem [resolvable:$true] %s482_s7 }
  0x6c   : > { %695 = vmatpush3.bf16.msra.mxu0 %v694_v5  ;;  %v365_v11 = vld [vmem:[#allocation7 + $0x8] sm:$0xff]  ;;  %v367_v13 = vld [vmem:[#allocation7 + $0x18] sm:$0xff]  ;;  %v700_v14 = vpack.c.bf16 %v275_v9, %v274_v8  ;;  %v276_v16 = vld [vmem:[#allocation5 + $0x30] sm:$0xff]  ;;  %s469_s16 = scalar_lea.sflag [#allocation4], %s1183_s12  ;;  %s903_s9 = scalar_lea.vmem %s1230_s7, 128 }
  0x6d   : > { %696 = vmatprep.subr.bf16.mxu0 %v980_v0  ;;  %v718_v15 = vpack.c.bf16 %v365_v11, %v364_v10  ;;  %v277_v17 = vld [vmem:[#allocation5 + $0x38] sm:$0xff]  ;;  %v721_v18 = vpack.c.bf16 %v367_v13, %v366_v12  ;;  %v368_v19 = vld [vmem:[#allocation7 + $0x20] sm:$0xff]  ;;  %v369_v20 = vld [vmem:[#allocation7 + $0x28] sm:$0xff]  ;;  %p904_p11 = scmp.ne.s32.totalorder %s1230_s7, %s903_s9  ;;  %p1291_p0 = scmp.ne.s32.totalorder %s1286_s23, 0 }
  0x6e   : > { %v703_v21 = vpack.c.bf16 %v277_v17, %v276_v16  ;;  %v278_v22 = vld [vmem:[#allocation5 + $0x40] sm:$0xff]  ;;  %v279_v23 = vld [vmem:[#allocation5 + $0x48] sm:$0xff]  ;;  %v724_v24 = vpack.c.bf16 %v369_v20, %v368_v19  ;;  %v370_v25 = vld [vmem:[#allocation7 + $0x30] sm:$0xff]  ;;  %s983_s22 = smov [#allocation8]  }
  0x6f   : > { %719 = vmatpush3.bf16.msra.mxu1 %v718_v15  ;;  %v371_v26 = vld [vmem:[#allocation7 + $0x38] sm:$0xff]  ;;  %v706_v27 = vpack.c.bf16 %v279_v23, %v278_v22  ;;  %v280_v28 = vld [vmem:[#allocation5 + $0x50] sm:$0xff]  ;;  %v372_v31 = vld [vmem:[#allocation7 + $0x40] sm:$0xff]  ;;  %p905_p1 = pnand %p904_p11, %p1291_p0  ;;  %s907_s13 = sshll.u32 %s983_s22, 4  ;;  %s908_s13 = int_to_ptr.vmem [resolvable:$false] %s907_s13 }
  0x70   : > { %698 = vmatpush3.bf16.msra.mxu0 %v697_v7  ;;  %720 = vmatprep.subr.bf16.mxu1 %v980_v0  ;;  %v281_v29 = vld [vmem:[#allocation5 + $0x58] sm:$0xff]  ;;  %v727_v30 = vpack.c.bf16 %v371_v26, %v370_v25  ;;  %v373_v32 = vld [vmem:[#allocation7 + $0x48] sm:$0xff]  ;;  %v282_v34 = vld [vmem:[#allocation5 + $0x60] sm:$0xff]  ;;  %s909_s29 = scalar_lea.vmem %s908_s13, 256  ;;  %p910_p7 = scmp.lt.s32.totalorder %s1230_s7, %s908_s13 }
  0x71   : > { %699 = vmatprep.subr.bf16.mxu0 %v980_v0  ;;  %v709_v33 = vpack.c.bf16 %v281_v29, %v280_v28  ;;  %v283_v35 = vld [vmem:[#allocation5 + $0x68] sm:$0xff]  ;;  %v730_v36 = vpack.c.bf16 %v373_v32, %v372_v31  ;;  %v374_v37 = vld [vmem:[#allocation7 + $0x50] sm:$0xff]  ;;  %v375_v38 = vld [vmem:[#allocation7 + $0x58] sm:$0xff]  ;;  %p906_p3 = pneg %p905_p1  ;;  %p911_p9 = scmp.lt.s32.totalorder %s909_s29, %s903_s9 }
  0x72   : > { %v712_v39 = vpack.c.bf16 %v283_v35, %v282_v34  ;;  %v284_v40 = vld [vmem:[#allocation5 + $0x70] sm:$0xff]  ;;  %v285_v41 = vld [vmem:[#allocation5 + $0x78] sm:$0xff]  ;;  %v733_v42 = vpack.c.bf16 %v375_v38, %v374_v37  ;;  %v376_v43 = vld [vmem:[#allocation7 + $0x60] sm:$0xff] }
  0x73   : > { %722 = vmatpush3.bf16.msra.mxu1 %v721_v18  ;;  %v377_v44 = vld [vmem:[#allocation7 + $0x68] sm:$0xff]  ;;  %v715_v45 = vpack.c.bf16 %v285_v41, %v284_v40  ;;  %v269_v47 = vld [vmem:[%s1189_s17] sm:$0xff]  ;;  %p912_p12 = por %p911_p9, %p910_p7 }
  0x74   : > { %701 = vmatpush3.bf16.msra.mxu0 %v700_v14  ;;  %723 = vmatprep.subr.bf16.mxu1 %v980_v0  ;;  %v736_v46 = vpack.c.bf16 %v377_v44, %v376_v43  ;;  %v378_v48 = vld [vmem:[#allocation7 + $0x70] sm:$0xff]  ;;  %v379_v49 = vld [vmem:[#allocation7 + $0x78] sm:$0xff] }
  0x75   : > { %702 = vmatprep.subr.bf16.mxu0 %v980_v0  ;;  %v739_v50 = vpack.c.bf16 %v379_v49, %v378_v48  ;;  %v583_v51 = vld [vmem:[%s1274_s2] ss:$0 sm:$0xff]  ;;  %p913_p2 = pnand %p912_p12, %p906_p3 }
  0x76   : > { %v584_v56 = vld [vmem:[%s1276_s4] ss:$0 sm:$0xff] }
  0x77   : > { %725 = vmatpush3.bf16.msra.mxu1 %v724_v24 }
  0x78   : > { %704 = vmatpush3.bf16.msra.mxu0 %v703_v21  ;;  %726 = vmatprep.subr.bf16.mxu1 %v980_v0 }
  0x79   : > { %705 = vmatprep.subr.bf16.mxu0 %v980_v0 }
  0x7b   : > { %728 = vmatpush3.bf16.msra.mxu1 %v727_v30 }
  0x7c   : > { %707 = vmatpush3.bf16.msra.mxu0 %v706_v27  ;;  %729 = vmatprep.subr.bf16.mxu1 %v980_v0 }
  0x7d   : > { %708 = vmatprep.subr.bf16.mxu0 %v980_v0 }
  0x7f   : > { %731 = vmatpush3.bf16.msra.mxu1 %v730_v36 }
  0x80   : > { %710 = vmatpush3.bf16.msra.mxu0 %v709_v33  ;;  %732 = vmatprep.subr.bf16.mxu1 %v980_v0 }
  0x81   : > { %711 = vmatprep.subr.bf16.mxu0 %v980_v0 }
  0x83   : > { %734 = vmatpush3.bf16.msra.mxu1 %v733_v42 }
  0x84   : > { %713 = vmatpush3.bf16.msra.mxu0 %v712_v39  ;;  %735 = vmatprep.subr.bf16.mxu1 %v980_v0 }
  0x85   : > { %714 = vmatprep.subr.bf16.mxu0 %v980_v0 }
  0x87   : > { %737 = vmatpush3.bf16.msra.mxu1 %v736_v46 }
  0x88   : > { %716 = vmatpush3.bf16.msra.mxu0 %v715_v45  ;;  %738 = vmatprep.subr.bf16.mxu1 %v980_v0 }
  0x8b   : > { %656 = vmatmul.mubr.f32.vlgmr.msra.gmra.mrb[0].mxu0 %v269_v47  ;;  %740 = vmatpush3.bf16.msra.mxu1 %v739_v50 }
 0x15e   : > { %v359_v52 = vpop.f32.mrb[0].mxu0 }
 0x15f   : > { %v360_v53 = vadd.f32 %v583_v51, %v359_v52  ;;  %v657_v54 = vpop.f32.mrb[1].mxu0 }
 0x161   : > { %v363_v55 = vmax.f32 %v360_v53, 0.0 }
 0x163   : > { %691 = vmatmul.mubr.f32.vlgmr.msra.gmra.mrb[0].mxu1 %v363_v55 }
 0x236   : > { %v453_v57 = vpop.f32.mrb[0].mxu1 }
 0x237   : > { %v454_v58 = vadd.f32 %v584_v56, %v453_v57  ;;  %v692_v59 = vpop.f32.mrb[1].mxu1 }
 0x239   : > { %457 = vmax.xlane.f32.xlu0 %v454_v58 }
 0x2c6   : > { %v458_v60 = vpop.xlane.xlu0 %457 }
 0x2c7   : > { %v459_v61 = vsub.f32 %v454_v58, %v458_v60 }
 0x2c9   : > { %v460_v62 = vmul.f32 1.442695, %v459_v61 }
 0x2cb   : > { %813 = vpow2.f32 %v460_v62 }
 0x2d5   : > { %v814_v63 = vpop.eup %813 }
 0x2d6   : > { %462 = vadd.xlane.f32.xlu0 %v814_v63 }
 0x363   : > { %v463_v0 = vpop.xlane.xlu0 %462 }
 0x364   : > { %815 = vlog2.f32 %v463_v0 }
 0x36e   : > { %v816_v1 = vpop.eup %815 }
 0x36f   : > { %v465_v2 = vmul.f32 0.6931472, %v816_v1 }
 0x371   : > { %v466_v3 = vsub.f32 %v459_v61, %v465_v2 }
 0x373   : > { %467 = vst [vmem:[%s268_s28] sm:$0xff] %v466_v3 }
 0x374   : > { %916 = shalt.err (!%p913_p2)
}
 0x375   : > { %s917_s12 = scalar_lea.hbm %s1228_s15, 128  ;;  %s921_s26 = scalar_lea.hbm %s1277_s5, 256 }
 0x376   : > { %p918_p13 = scmp.ne.s32.totalorder %s1228_s15, %s917_s12  ;;  %p922_p4 = scmp.lt.u32.totalorder %s1228_s15, %s1277_s5 }
 0x377   : > { %p923_p5 = scmp.lt.u32.totalorder %s921_s26, %s917_s12  ;;  %p925_p11 = scmp.lt.u32.totalorder %s917_s12, %s1228_s15 }
 0x378   : > { %p919_p6 = pnand %p918_p13, %p1291_p0 }
 0x379   : > { %p924_p8 = por %p923_p5, %p922_p4 }
 0x37a   : > { %p920_p10 = pneg %p919_p6 }
 0x37b   : > { %p926_p1 = por %p925_p11, %p924_p8 }
 0x37d   : > { %p927_p3 = pnand %p926_p1, %p920_p10 }
 0x37f   : > { %930 = shalt.err (!%p927_p3)
}
 0x380   : > { %751 = dma.vmem_to_hbm [thread:$0]  (%p1291_p0), %s1230_s7, 128, %s1228_s15, %s469_s16  }
 0x381 PF: > { %s494_s11 = sand.u32 1, %s961_s18   ;;  %p1292_p7 = scmp.ne.s32.totalorder %s1282_s25, 0 }
 0x382   : > { %p1293_p9 = scmp.ge.s32.totalorder %s973_s21, 2  ;;  %s495_s28 = scalar_lea.sflag [#allocation4], %s494_s11 }
 0x384   : > { %p765_p12 = pnand %p1293_p9, %p1292_p7 }
 0x386   : > { %956 = dma.done.wait (!%p765_p12), %s495_s28, 128  }
 0x387   : > { %958 = vsyncadd (!%p765_p12), %s495_s28, 4294967168  ;;  %p19_p2 = scmp.ge.s32.totalorder %s1124_s14, 4   ;;  %s1294_s18 = smov %s965_s19 }
 0x388   : > { %s1295_s19 = smov %s969_s20  ;;  %s1296_s20 = smov %s1140_s27 }
 0x389   : > { %s1297_s21 = smov %s1124_s14  ;;  %21 = sbr.rel (!%p19_p2) target bundleno = 6 (0x6), region = 93 }
 0x390   :  { %500 = vsyncpa [#allocation3], 1 }
 0x391   :  { %502 = vsyncpa [#allocation3 + $0x1], 1 }
 0x392   :  { %503 = vsyncpa [#allocation6], 1 }
 0x393   :  { %504 = vsyncpa [#allocation4], 1 }
 0x394   :  { %506 = vsyncpa [#allocation4 + $0x1], 1 }

</bundles_post_ra>
